<compile_context>
chip_gen: v5e
topology: v5e:2x2
jax: 0.10.0
libtpu: 0.0.40
codegen_flags: <defaults>
</compile_context>

<pallas_src>
import functools

import jax
import jax.numpy as jnp
from jax import lax
from jax.experimental import pallas as pl
from jax.experimental.pallas import tpu as pltpu


def _simmin_kernel(bg_ref, fg_ref, out_ref, *, n, tm, tn, mask_rows, mask_cols):
    j = pl.program_id(1)

    bg = bg_ref[...].astype(jnp.float32)   # (tm, C)
    fg = fg_ref[...].astype(jnp.float32)   # (tn, C)

    # x / max(||x||, 1e-12)  ==  x * rsqrt(max(sum(x^2), 1e-24))
    eps_sq = jnp.float32(1e-24)
    bg_n = bg * lax.rsqrt(jnp.maximum(jnp.sum(bg * bg, axis=1, keepdims=True), eps_sq))
    fg_n = fg * lax.rsqrt(jnp.maximum(jnp.sum(fg * fg, axis=1, keepdims=True), eps_sq))

    # Keep bf16 operands on the MXU (f32 accumulate) when inputs are bf16.
    if bg_ref.dtype == jnp.bfloat16:
        bg_n = bg_n.astype(jnp.bfloat16)
        fg_n = fg_n.astype(jnp.bfloat16)

    # sim[i, j] = <bg_n_i, fg_n_j>: contract last dims directly, no transpose.
    sim = lax.dot_general(
        bg_n, fg_n,
        dimension_numbers=(((1,), (1,)), ((), ())),
        preferred_element_type=jnp.float32)
    sim = jnp.clip(sim, 0.0005, 0.9995)
    loss = -jnp.log(1.0 - sim)

    # Zero contributions from out-of-bounds (padded) rows / cols when the
    # tile sizes do not divide N.
    if mask_rows or mask_cols:
        i = pl.program_id(0)
        valid = jnp.ones((tm, tn), dtype=jnp.bool_)
        if mask_rows:
            rows = i * tm + lax.broadcasted_iota(jnp.int32, (tm, tn), 0)
            valid = valid & (rows < n)
        if mask_cols:
            cols = j * tn + lax.broadcasted_iota(jnp.int32, (tm, tn), 1)
            valid = valid & (cols < n)
        loss = jnp.where(valid, loss, 0.0)

    @pl.when(j == 0)
    def _():
        out_ref[...] = jnp.zeros_like(out_ref)

    # Per-row partial sums, accumulated across the column (reduction) axis.
    out_ref[...] += jnp.sum(loss, axis=1, keepdims=True)


def sim_min_loss(embedded_bg: jax.Array, embedded_fg: jax.Array,
                 *, tile_m: int = 256, tile_n: int = 256) -> jax.Array:
    """embedded_bg: [N, C], embedded_fg: [N, C] -> scalar f32 loss (mean)."""
    n, c = embedded_bg.shape
    assert embedded_fg.shape == (n, c)

    tm = n if n <= tile_m else tile_m
    tn = n if n <= tile_n else tile_n
    gi = pl.cdiv(n, tm)
    gj = pl.cdiv(n, tn)

    kernel = functools.partial(
        _simmin_kernel, n=n, tm=tm, tn=tn,
        mask_rows=(n % tm != 0), mask_cols=(n % tn != 0))

    partial_row_sums = pl.pallas_call(
        kernel,
        out_shape=jax.ShapeDtypeStruct((gi * tm, 1), jnp.float32),
        grid=(gi, gj),
        in_specs=[
            pl.BlockSpec((tm, c), lambda i, j: (i, 0)),   # bg row tile
            pl.BlockSpec((tn, c), lambda i, j: (j, 0)),   # fg "column" tile
        ],
        out_specs=pl.BlockSpec((tm, 1), lambda i, j: (i, 0)),
        compiler_params=pltpu.CompilerParams(
            dimension_semantics=("parallel", "arbitrary")),
    )(embedded_bg, embedded_fg)

    return jnp.sum(partial_row_sums) * jnp.float32(1.0 / (n * n))


def _ref_loss(bg, fg):
    bg_n = bg / jnp.maximum(jnp.linalg.norm(bg, axis=1, keepdims=True), 1e-12)
    fg_n = fg / jnp.maximum(jnp.linalg.norm(fg, axis=1, keepdims=True), 1e-12)
    sim = jnp.clip(bg_n @ fg_n.T, 0.0005, 0.9995)
    return jnp.mean(-jnp.log(1.0 - sim))


if __name__ == "__main__":
    key = jax.random.PRNGKey(0)

    # Small problem matching the module's [N, C] inputs.
    k_bg, k_fg = jax.random.split(key)
    N, C = 8, 32
    embedded_bg = jax.random.normal(k_bg, (N, C), dtype=jnp.float32)
    embedded_fg = jax.random.normal(k_fg, (N, C), dtype=jnp.float32)

    loss = sim_min_loss(embedded_bg, embedded_fg)
    jax.block_until_ready(loss)
    ref = _ref_loss(embedded_bg, embedded_fg)
    assert jnp.allclose(loss, ref, rtol=1e-5, atol=1e-5), (loss, ref)

    # Exercise the tiled + masked path (N not a multiple of the 256 tile).
    k_bg2, k_fg2 = jax.random.split(jax.random.PRNGKey(0), 2)
    N2, C2 = 320, 64
    bg2 = jax.random.normal(k_bg2, (N2, C2), dtype=jnp.float32)
    fg2 = jax.random.normal(k_fg2, (N2, C2), dtype=jnp.float32)
    loss2 = sim_min_loss(bg2, fg2)
    jax.block_until_ready(loss2)
    ref2 = _ref_loss(bg2, fg2)
    assert jnp.allclose(loss2, ref2, rtol=1e-5, atol=1e-5), (loss2, ref2)

    print("KERNEL_OK")
</pallas_src>

<mosaic_0001>
module attributes {stable_mosaic.version = 11 : i64} {
  func.func @_simmin_kernel(%arg0: i32, %arg1: i32, %arg2: memref<8x32xf32, #tpu.memory_space<vmem>>, %arg3: memref<8x32xf32, #tpu.memory_space<vmem>>, %arg4: memref<8x1xf32, #tpu.memory_space<vmem>>) attributes {dimension_semantics = [#tpu.dimension_semantics<parallel>, #tpu.dimension_semantics<arbitrary>], iteration_bounds = array<i64: 1, 1>, scalar_prefetch = 0 : i64, scratch_operands = 0 : i64, tpu.core_type = #tpu.core_type<tc>, window_params = [{transform_indices = @transform_0, window_bounds = array<i64: 8, 32>}, {transform_indices = @transform_1, window_bounds = array<i64: 8, 32>}, {transform_indices = @transform_2, window_bounds = array<i64: 8, 1>}]} {
    %c0 = arith.constant 0 : index
    %c0_0 = arith.constant 0 : index
    %0 = vector.load %arg2[%c0, %c0_0] : memref<8x32xf32, #tpu.memory_space<vmem>>, vector<8x32xf32>
    %c0_1 = arith.constant 0 : index
    %c0_2 = arith.constant 0 : index
    %1 = vector.load %arg3[%c0_1, %c0_2] : memref<8x32xf32, #tpu.memory_space<vmem>>, vector<8x32xf32>
    %2 = arith.mulf %0, %0 : vector<8x32xf32>
    %cst = arith.constant dense<0.000000e+00> : vector<8xf32>
    %3 = vector.multi_reduction <add>, %2, %cst [1] : vector<8x32xf32> to vector<8xf32>
    %4 = vector.shape_cast %3 : vector<8xf32> to vector<8x1xf32>
    %cst_3 = arith.constant 1.000000e-24 : f32
    %5 = vector.broadcast %cst_3 : f32 to vector<8x1xf32>
    %6 = arith.maximumf %4, %5 : vector<8x1xf32>
    %7 = math.rsqrt %6 : vector<8x1xf32>
    %8 = vector.broadcast %7 : vector<8x1xf32> to vector<8x32xf32>
    %9 = arith.mulf %0, %8 : vector<8x32xf32>
    %10 = arith.mulf %1, %1 : vector<8x32xf32>
    %cst_4 = arith.constant dense<0.000000e+00> : vector<8xf32>
    %11 = vector.multi_reduction <add>, %10, %cst_4 [1] : vector<8x32xf32> to vector<8xf32>
    %12 = vector.shape_cast %11 : vector<8xf32> to vector<8x1xf32>
    %cst_5 = arith.constant 1.000000e-24 : f32
    %13 = vector.broadcast %cst_5 : f32 to vector<8x1xf32>
    %14 = arith.maximumf %12, %13 : vector<8x1xf32>
    %15 = math.rsqrt %14 : vector<8x1xf32>
    %16 = vector.broadcast %15 : vector<8x1xf32> to vector<8x32xf32>
    %17 = arith.mulf %1, %16 : vector<8x32xf32>
    %cst_6 = arith.constant dense<0.000000e+00> : vector<8x8xf32>
    %18 = tpu.matmul %9, %17, %cst_6 {dimension_numbers = #tpu.dot_dimension_numbers<[1], [1], [0], [0], [0, 0, 1, 0], [], []>} : vector<8x32xf32>, vector<8x32xf32>, vector<8x8xf32> -> vector<8x8xf32>
    %cst_7 = arith.constant 5.000000e-04 : f32
    %cst_8 = arith.constant 0.999499976 : f32
    %19 = vector.broadcast %cst_7 : f32 to vector<8x8xf32>
    %20 = arith.maximumf %19, %18 : vector<8x8xf32>
    %21 = vector.broadcast %cst_8 : f32 to vector<8x8xf32>
    %22 = arith.minimumf %21, %20 : vector<8x8xf32>
    %cst_9 = arith.constant 1.000000e+00 : f32
    %23 = vector.broadcast %cst_9 : f32 to vector<8x8xf32>
    %24 = arith.subf %23, %22 : vector<8x8xf32>
    %25 = math.log %24 : vector<8x8xf32>
    %cst_10 = arith.constant 0.000000e+00 : f32
    %26 = vector.broadcast %cst_10 : f32 to vector<8x8xf32>
    %27 = arith.subf %26, %25 : vector<8x8xf32>
    %c0_i32 = arith.constant 0 : i32
    %28 = arith.cmpi eq, %arg1, %c0_i32 : i32
    %29 = arith.extui %28 : i1 to i32
    %c0_i32_11 = arith.constant 0 : i32
    %30 = arith.cmpi ne, %29, %c0_i32_11 : i32
    scf.if %30 {
      %cst_17 = arith.constant 0.000000e+00 : f32
      %36 = vector.broadcast %cst_17 : f32 to vector<8x1xf32>
      %c0_18 = arith.constant 0 : index
      %c0_19 = arith.constant 0 : index
      %37 = vector.load %arg4[%c0_18, %c0_19] : memref<8x1xf32, #tpu.memory_space<vmem>>, vector<8x1xf32>
      tpu.vector_store %arg4[%c0_18, %c0_19], %36 {strides = array<i32>} : memref<8x1xf32, #tpu.memory_space<vmem>>, vector<8x1xf32>,
    } else {
    }
    %c0_12 = arith.constant 0 : index
    %c0_13 = arith.constant 0 : index
    %31 = vector.load %arg4[%c0_12, %c0_13] : memref<8x1xf32, #tpu.memory_space<vmem>>, vector<8x1xf32>
    %cst_14 = arith.constant dense<0.000000e+00> : vector<8xf32>
    %32 = vector.multi_reduction <add>, %27, %cst_14 [1] : vector<8x8xf32> to vector<8xf32>
    %33 = vector.shape_cast %32 : vector<8xf32> to vector<8x1xf32>
    %34 = arith.addf %31, %33 : vector<8x1xf32>
    %c0_15 = arith.constant 0 : index
    %c0_16 = arith.constant 0 : index
    %35 = vector.load %arg4[%c0_15, %c0_16] : memref<8x1xf32, #tpu.memory_space<vmem>>, vector<8x1xf32>
    tpu.vector_store %arg4[%c0_15, %c0_16], %34 {strides = array<i32>} : memref<8x1xf32, #tpu.memory_space<vmem>>, vector<8x1xf32>,
    return
  }
  func.func @transform_0(%arg0: i32, %arg1: i32) -> (i32, i32) {
    %c0_i32 = arith.constant 0 : i32
    %c0_i32_0 = arith.constant 0 : i32
    return %arg0, %c0_i32 : i32, i32
  }
  func.func @transform_1(%arg0: i32, %arg1: i32) -> (i32, i32) {
    %c0_i32 = arith.constant 0 : i32
    %c0_i32_0 = arith.constant 0 : i32
    return %arg1, %c0_i32 : i32, i32
  }
  func.func @transform_2(%arg0: i32, %arg1: i32) -> (i32, i32) {
    %c0_i32 = arith.constant 0 : i32
    %c0_i32_0 = arith.constant 0 : i32
    return %arg0, %c0_i32 : i32, i32
  }
}

</mosaic_0001>

<bundles_post_ra>
// kernel: tpu_custom_call.1
= control target key start
LH: loop header
LB: loop body
LE: loop exit
PB: predicated region body
PF: predicated region fallthrough
CT: control target
= control target key end

     0   :  { %7 = vsyncpa [#allocation3], 0  ;;  %s228_s0 = inlined_call_operand.hbm [shape: f32[8,32], index: 0, kind: input, shape index: {}]   ;;  %s229_s1 = inlined_call_operand.hbm [shape: f32[8,32], index: 1, kind: input, shape index: {}]   ;;  %s230_s2 = inlined_call_operand.vmem [shape: f32[8,1], index: 2, kind: output, shape index: {}]  }
   0x1   :  { %s14_s11 = sshll.u32 %s228_s0, 4  ;;  %s15_s11 = int_to_ptr.hbm [resolvable:$true] %s14_s11 }
   0x2   :  { %8 = vsyncpa [#allocation5], 0  ;;  %s189_s12 = smov [#allocation2]   ;;  %s25_s16 = sshll.u32 %s229_s1, 4  ;;  %s26_s16 = int_to_ptr.hbm [resolvable:$true] %s25_s16 }
   0x3   :  { %s16_s13 = sshll.u32 %s189_s12, 4  ;;  %s190_s17 = smov [#allocation4]   ;;  %s17_s13 = int_to_ptr.vmem [resolvable:$true] %s16_s13 }
   0x4   :  { %19 = dma.hbm_to_vmem [thread:$0]  %s15_s11, 128, %s17_s13, [#allocation3]  }
   0x5   :  { %s27_s18 = sshll.u32 %s190_s17, 4  ;;  %s28_s18 = int_to_ptr.vmem [resolvable:$true] %s27_s18 }
   0x6   :  { %30 = dma.hbm_to_vmem [thread:$0]  %s26_s16, 128, %s28_s18, [#allocation5]  }
   0x7   :  { %185 = dma.done.wait [#allocation3], 128  }
   0x8   :  { %186 = vsyncadd [#allocation3], 4294967168 }
   0x9   :  { %187 = dma.done.wait [#allocation5], 128  }
   0xa   :  { %188 = vsyncadd [#allocation5], 4294967168  ;;  %vm110_vm0 = vcmask 7168   ;;  %v191_v0 = vmov 0.0   ;;  %v40_v1 = vld [vmem:[#allocation4] sm:$0xff]  ;;  %vm42_vm1 = vcmask 261120  }
   0xb   :  { %111 = vst.msk [vmem:[%s230_s2] sm:$0xff] %vm110_vm0, %v191_v0  ;;  %v58_v2 = vmul.f32 %v40_v1, %v40_v1  ;;  %v39_v3 = vld [vmem:[#allocation2] sm:$0xff]  ;;  %vm113_vm8 = vcmask 64512  }
   0xc   :  { %v41_v5 = vmul.f32 %v39_v3, %v39_v3 }
   0xd   :  { %v59_v4 = vsel %vm42_vm1, %v58_v2, 0.0 }
   0xe   :  { %60 = vadd.xlane.f32.xlu0 %v59_v4  ;;  %v43_v6 = vsel %vm42_vm1, %v41_v5, 0.0 }
  0x12   :  { %v112_v35 = vld [vmem:[%s230_s2] sm:$0xff] }
  0x16   :  { %44 = vadd.xlane.f32.xlu0 %v43_v6 }
  0x81   :  { %v61_v7 = vpop.xlane.xlu0 %60 }
  0x82   :  { %v62_v8 = vmax.f32 %v61_v7, 1e-24 }
  0x84   :  { %131 = vrsqrt.f32 %v62_v8  ;;  %vm69_vm3 = vweird.f32 %v62_v8 }
  0x89   :  { %v45_v9 = vpop.xlane.xlu0 %44 }
  0x8a   :  { %v132_v10 = vpop.eup %131  ;;  %v46_v11 = vmax.f32 %v45_v9, 1e-24 }
  0x8b   :  { %v64_v12 = vmul.f32 %v132_v10, %v62_v8  ;;  %vm70_vm2 = vweird.f32 %v132_v10 }
  0x8c   :  { %133 = vrsqrt.f32 %v46_v11  ;;  %vm71_vm4 = vmor %vm69_vm3, %vm70_vm2  ;;  %vm53_vm6 = vweird.f32 %v46_v11 }
  0x8d   :  { %v65_v13 = vmul.f32 %v132_v10, %v64_v12 }
  0x8f   :  { %v66_v14 = vmul.f32 0.5, %v65_v13 }
  0x91   :  { %v67_v15 = vsub.f32 1.5, %v66_v14 }
  0x92   :  { %v134_v16 = vpop.eup %133 }
  0x93   :  { %v48_v17 = vmul.f32 %v134_v16, %v46_v11  ;;  %v68_v18 = vmul.f32 %v132_v10, %v67_v15  ;;  %vm54_vm5 = vweird.f32 %v134_v16 }
  0x94   :  { %vm55_vm7 = vmor %vm53_vm6, %vm54_vm5 }
  0x95   :  { %v49_v19 = vmul.f32 %v134_v16, %v48_v17  ;;  %v72_v20 = vsel %vm71_vm4, %v132_v10, %v68_v18 }
  0x96   :  { %v73_v21 = vmul.f32 %v72_v20, %v40_v1 }
  0x97   :  { %v50_v22 = vmul.f32 0.5, %v49_v19 }
  0x98   :  { %126 = vmatpush.xpose.msk.msra.mxu0 %vm42_vm1, %v73_v21 }
  0x99   :  { %v51_v23 = vsub.f32 1.5, %v50_v22 }
  0x9b   :  { %v52_v24 = vmul.f32 %v134_v16, %v51_v23 }
  0x9d   :  { %v56_v25 = vsel %vm55_vm7, %v134_v16, %v52_v24 }
  0x9e   :  { %v57_v26 = vmul.f32 %v56_v25, %v39_v3 }
  0xa0   :  { %127 = vmatmul.msk.f32.vlgmr.msra.gmra.mxu0 %vm42_vm1, %v57_v26 }
 0x11d   :  { %v97_v27 = vpop.f32.mrf.mxu0 }
 0x11e   :  { %v100_v28 = vmax.f32 %v97_v27, 0.0005 }
 0x120   :  { %v101_v29 = vmin.f32 %v100_v28, 0.9995 }
 0x122   :  { %v102_v30 = vsub.f32 1.0, %v101_v29 }
 0x124   :  { %135 = vlog2.f32 %v102_v30 }
 0x12a   :  { %v136_v31 = vpop.eup %135 }
 0x12b   :  { %v104_v32 = vmul.f32 0.6931472, %v136_v31 }
 0x12d   :  { %v105_v33 = vsub.f32 0.0, %v104_v32 }
 0x12f   :  { %v114_v34 = vsel %vm113_vm8, %v105_v33, 0.0 }
 0x130   :  { %115 = vadd.xlane.f32.xlu1 %v114_v34 }
 0x1a3   :  { %v116_v36 = vpop.xlane.xlu1 %115 }
 0x1a4   :  { %v117_v37 = vadd.f32 %v116_v36, %v112_v35 }
 0x1a6   :  { %119 = vst.msk [vmem:[%s230_s2] sm:$0xff] %vm110_vm0, %v117_v37 }
 0x1a7   :  { %124 = vsyncpa [#allocation3], 1 }
 0x1a8   :  { %125 = vsyncpa [#allocation5], 1 }

</bundles_post_ra>
